<compile_context>
chip_gen: v5e
topology: v5e:2x2
jax: 0.10.0
libtpu: 0.0.40
codegen_flags: <defaults>
</compile_context>

<pallas_src>
import jax
import jax.numpy as jnp
from jax.experimental import pallas as pl
from jax.experimental.pallas import tpu as pltpu


def _round_up(x: int, m: int) -> int:
    return (x + m - 1) // m * m


def _vmem_capacity_bytes() -> int:
    """Per-core VMEM capacity; conservative fallback if the query fails."""
    try:
        return int(pltpu.get_tpu_info().vmem_capacity_bytes)
    except Exception:
        return 64 * 1024 * 1024  # v7x per-TC (smallest of the three gens)


def _pipe_stages_kernel(x_ref, w_ref, b_ref, o_ref, act_ref):
    """Grid = (row_tile i, stage k).  One step: act = relu(act @ W_k + b_k).

    The activation is carried across stages in a bf16 VMEM scratch; the f32
    output block (constant index along the stage axis, so resident in VMEM)
    is written only once, at the final stage.
    """
    k = pl.program_id(1)
    last = pl.num_programs(1) - 1

    @pl.when(k == 0)
    def _():
        # First stage of this row tile consumes the pipeline input (bf16).
        act_ref[...] = x_ref[...]

    # bf16 MXU matmul with f32 accumulation; w_ref/b_ref are this stage's
    # streamed blocks (leading stage dim squeezed by the BlockSpec).
    y = jnp.dot(act_ref[...], w_ref[...], preferred_element_type=jnp.float32)
    y = jnp.maximum(y + b_ref[...], 0.0)          # (tm, hp) f32, bias broadcasts

    @pl.when(k < last)
    def _():
        act_ref[...] = y.astype(jnp.bfloat16)     # hand activation to next stage

    @pl.when(k == last)
    def _():
        o_ref[...] = y.astype(o_ref.dtype)        # single f32 writeback


def pipe_forward(x, weights, biases):
    """Run the synthetic pipeline.

    x:       [batch, seq, hidden] float32
    weights: [num_stages, hidden, hidden] float32
    biases:  [num_stages, 1, hidden] float32
    returns: [batch, seq, hidden] float32
    """
    b, s, h = x.shape
    num_stages = weights.shape[0]
    n = b * s

    # Lane-dense hidden (multiple of 128).
    hp = _round_up(h, 128)

    # --- Generation-aware VMEM budget and row-tile sizing --------------------
    vmem_cap = _vmem_capacity_bytes()
    budget = int(vmem_cap * 0.8)                  # ~20% headroom

    # Steady-state VMEM with per-stage weight streaming:
    #   weight  bf16 x 2 bufs : 2*hp*hp*2
    #   bias    f32  x 2 bufs : 2*hp*4
    #   x       bf16 x 2 bufs : 2*tm*hp*2
    #   out     f32  x 2 bufs : 2*tm*hp*4
    #   carry   bf16 scratch  :   tm*hp*2
    fixed = 2 * hp * hp * 2 + 2 * hp * 4
    per_row = hp * (2 * 2 + 2 * 4 + 2)            # 14 bytes per activation element
    tm_cap = max(8, (budget - fixed) // per_row)

    n8 = _round_up(n, 8)
    tm = min(768, n8, tm_cap)                     # 768 = 6*128: MXU/lane friendly
    tm = max(8, (tm // 8) * 8)
    # Keep >= 2 row tiles when there is enough work (megacore sharding on v7x).
    if n8 >= 16 and n8 // tm < 2:
        tm = max(8, _round_up((n8 + 1) // 2, 8))

    n_pad = _round_up(n, tm)
    num_row_tiles = n_pad // tm

    # --- Padding (exact for Linear+ReLU; padded rows sliced off) -------------
    x2d = jnp.pad(x.reshape(n, h).astype(jnp.bfloat16),
                  ((0, n_pad - n), (0, hp - h)))
    w_p = jnp.pad(weights.astype(jnp.bfloat16),
                  ((0, 0), (0, hp - h), (0, hp - h)))
    b_p = jnp.pad(biases.astype(jnp.float32),
                  ((0, 0), (0, 0), (0, hp - h)))

    cost = pl.CostEstimate(
        flops=2 * num_stages * n_pad * hp * hp,
        transcendentals=0,
        bytes_accessed=n_pad * hp * 2                                   # x (bf16)
        + n_pad * hp * 4                                                # out (f32)
        + num_row_tiles * num_stages * (hp * hp * 2 + hp * 4),          # streamed W/b
    )

    out = pl.pallas_call(
        _pipe_stages_kernel,
        out_shape=jax.ShapeDtypeStruct((n_pad, hp), jnp.float32),
        grid_spec=pltpu.PrefetchScalarGridSpec(
            num_scalar_prefetch=0,
            grid=(num_row_tiles, num_stages),
            in_specs=[
                # Row tile of the input; constant along k -> fetched once per i.
                pl.BlockSpec((tm, hp), lambda i, k: (i, 0)),
                # Stage-k weight, streamed (leading stage dim squeezed).
                pl.BlockSpec((None, hp, hp), lambda i, k: (k, 0, 0)),
                # Stage-k bias, streamed.
                pl.BlockSpec((None, 1, hp), lambda i, k: (k, 0, 0)),
            ],
            # Constant block index along the stage axis -> resident output block,
            # written only at the final stage.
            out_specs=pl.BlockSpec((tm, hp), lambda i, k: (i, 0)),
            scratch_shapes=[pltpu.VMEM((tm, hp), jnp.bfloat16)],
        ),
        compiler_params=pltpu.CompilerParams(
            dimension_semantics=("parallel", "arbitrary"),
            vmem_limit_bytes=budget,
        ),
        cost_estimate=cost,
    )(x2d, w_p, b_p)

    return out[:n, :h].reshape(b, s, h).astype(x.dtype)


def pipe_forward_ref(x, weights, biases):
    """Pure-JAX reference (same bf16-matmul / f32-accumulate math)."""
    b, s, h = x.shape
    act = x.reshape(b * s, h).astype(jnp.float32)
    for k in range(weights.shape[0]):
        y = jnp.dot(act.astype(jnp.bfloat16), weights[k].astype(jnp.bfloat16),
                    preferred_element_type=jnp.float32)
        act = jnp.maximum(y + biases[k], 0.0)
    return act.reshape(b, s, h)


if __name__ == "__main__":
    # Small deterministic setup: batch=2, seq=8, hidden=32, 2 pipeline stages.
    batch, seq, hidden, num_stages = 2, 8, 32, 2

    key = jax.random.PRNGKey(0)
    kx, kw, kb = jax.random.split(key, 3)

    x = jax.random.normal(kx, (batch, seq, hidden), dtype=jnp.float32)
    weights = (
        jax.random.normal(kw, (num_stages, hidden, hidden), dtype=jnp.float32)
        * (1.0 / jnp.sqrt(hidden))
    )
    biases = jax.random.normal(kb, (num_stages, 1, hidden), dtype=jnp.float32) * 0.1

    out = jax.block_until_ready(pipe_forward(x, weights, biases))
    ref = pipe_forward_ref(x, weights, biases)

    assert out.shape == (batch, seq, hidden)
    assert jnp.allclose(out, ref, atol=1e-2, rtol=1e-2), "mismatch vs reference"

    print("KERNEL_OK")
</pallas_src>

<mosaic_0001>
module attributes {stable_mosaic.version = 11 : i64} {
  func.func @_pipe_stages_kernel(%arg0: i32, %arg1: i32, %arg2: memref<8x128xbf16, #tpu.memory_space<vmem>>, %arg3: memref<1x128x128xbf16, #tpu.memory_space<vmem>>, %arg4: memref<1x1x128xf32, #tpu.memory_space<vmem>>, %arg5: memref<8x128xf32, #tpu.memory_space<vmem>>, %arg6: memref<8x128xbf16, #tpu.memory_space<vmem>>) attributes {dimension_semantics = [#tpu.dimension_semantics<parallel>, #tpu.dimension_semantics<arbitrary>], iteration_bounds = array<i64: 2, 2>, scalar_prefetch = 0 : i64, scratch_operands = 1 : i64, tpu.core_type = #tpu.core_type<tc>, window_params = [{transform_indices = @transform_0, window_bounds = array<i64: 8, 128>}, {transform_indices = @transform_1, window_bounds = array<i64: 1, 128, 128>}, {transform_indices = @transform_2, window_bounds = array<i64: 1, 1, 128>}, {transform_indices = @transform_3, window_bounds = array<i64: 8, 128>}]} {
    %c0_i32 = arith.constant 0 : i32
    %0 = arith.cmpi eq, %arg1, %c0_i32 : i32
    %1 = arith.extui %0 : i1 to i32
    %c0_i32_0 = arith.constant 0 : i32
    %2 = arith.cmpi ne, %1, %c0_i32_0 : i32
    scf.if %2 {
      %c0_12 = arith.constant 0 : index
      %c0_13 = arith.constant 0 : index
      %19 = vector.load %arg2[%c0_12, %c0_13] : memref<8x128xbf16, #tpu.memory_space<vmem>>, vector<8x128xbf16>
      %c0_14 = arith.constant 0 : index
      %c0_15 = arith.constant 0 : index
      %20 = vector.load %arg6[%c0_14, %c0_15] : memref<8x128xbf16, #tpu.memory_space<vmem>>, vector<8x128xbf16>
      tpu.vector_store %arg6[%c0_14, %c0_15], %19 {strides = array<i32>} : memref<8x128xbf16, #tpu.memory_space<vmem>>, vector<8x128xbf16>,
    } else {
    }
    %c0 = arith.constant 0 : index
    %c0_1 = arith.constant 0 : index
    %3 = vector.load %arg6[%c0, %c0_1] : memref<8x128xbf16, #tpu.memory_space<vmem>>, vector<8x128xbf16>
    %c0_2 = arith.constant 0 : index
    %c0_3 = arith.constant 0 : index
    %c0_4 = arith.constant 0 : index
    %4 = vector.load %arg3[%c0_2, %c0_3, %c0_4] : memref<1x128x128xbf16, #tpu.memory_space<vmem>>, vector<1x128x128xbf16>
    %5 = vector.shape_cast %4 : vector<1x128x128xbf16> to vector<128x128xbf16>
    %cst = arith.constant dense<0.000000e+00> : vector<8x128xf32>
    %6 = tpu.matmul %3, %5, %cst {dimension_numbers = #tpu.dot_dimension_numbers<[1], [0], [0], [1], [0, 0, 1, 1], [], []>} : vector<8x128xbf16>, vector<128x128xbf16>, vector<8x128xf32> -> vector<8x128xf32>
    %c0_5 = arith.constant 0 : index
    %c0_6 = arith.constant 0 : index
    %c0_7 = arith.constant 0 : index
    %7 = vector.load %arg4[%c0_5, %c0_6, %c0_7] : memref<1x1x128xf32, #tpu.memory_space<vmem>>, vector<1x1x128xf32>
    %8 = vector.shape_cast %7 : vector<1x1x128xf32> to vector<1x128xf32>
    %9 = vector.broadcast %8 : vector<1x128xf32> to vector<8x128xf32>
    %10 = arith.addf %6, %9 : vector<8x128xf32>
    %cst_8 = arith.constant 0.000000e+00 : f32
    %11 = vector.broadcast %cst_8 : f32 to vector<8x128xf32>
    %12 = arith.maximumf %10, %11 : vector<8x128xf32>
    %c1_i32 = arith.constant 1 : i32
    %13 = arith.cmpi slt, %arg1, %c1_i32 : i32
    %14 = arith.extui %13 : i1 to i32
    %c0_i32_9 = arith.constant 0 : i32
    %15 = arith.cmpi ne, %14, %c0_i32_9 : i32
    scf.if %15 {
      %19 = arith.truncf %12 : vector<8x128xf32> to vector<8x128xbf16>
      %c0_12 = arith.constant 0 : index
      %c0_13 = arith.constant 0 : index
      %20 = vector.load %arg6[%c0_12, %c0_13] : memref<8x128xbf16, #tpu.memory_space<vmem>>, vector<8x128xbf16>
      tpu.vector_store %arg6[%c0_12, %c0_13], %19 {strides = array<i32>} : memref<8x128xbf16, #tpu.memory_space<vmem>>, vector<8x128xbf16>,
    } else {
    }
    %c1_i32_10 = arith.constant 1 : i32
    %16 = arith.cmpi eq, %arg1, %c1_i32_10 : i32
    %17 = arith.extui %16 : i1 to i32
    %c0_i32_11 = arith.constant 0 : i32
    %18 = arith.cmpi ne, %17, %c0_i32_11 : i32
    scf.if %18 {
      %c0_12 = arith.constant 0 : index
      %c0_13 = arith.constant 0 : index
      %19 = vector.load %arg5[%c0_12, %c0_13] : memref<8x128xf32, #tpu.memory_space<vmem>>, vector<8x128xf32>
      tpu.vector_store %arg5[%c0_12, %c0_13], %12 {strides = array<i32>} : memref<8x128xf32, #tpu.memory_space<vmem>>, vector<8x128xf32>,
    } else {
    }
    return
  }
  func.func @transform_0(%arg0: i32, %arg1: i32) -> (i32, i32) {
    %c0_i32 = arith.constant 0 : i32
    %c0_i32_0 = arith.constant 0 : i32
    return %arg0, %c0_i32 : i32, i32
  }
  func.func @transform_1(%arg0: i32, %arg1: i32) -> (i32, i32, i32) {
    %c0_i32 = arith.constant 0 : i32
    %c0_i32_0 = arith.constant 0 : i32
    %c0_i32_1 = arith.constant 0 : i32
    return %arg1, %c0_i32, %c0_i32_0 : i32, i32, i32
  }
  func.func @transform_2(%arg0: i32, %arg1: i32) -> (i32, i32, i32) {
    %c0_i32 = arith.constant 0 : i32
    %c0_i32_0 = arith.constant 0 : i32
    %c0_i32_1 = arith.constant 0 : i32
    return %arg1, %c0_i32, %c0_i32_0 : i32, i32, i32
  }
  func.func @transform_3(%arg0: i32, %arg1: i32) -> (i32, i32) {
    %c0_i32 = arith.constant 0 : i32
    %c0_i32_0 = arith.constant 0 : i32
    return %arg0, %c0_i32 : i32, i32
  }
}

</mosaic_0001>

<bundles_post_ra>
// kernel: tpu_custom_call.1
= control target key start
LH: loop header
LB: loop body
LE: loop exit
PB: predicated region body
PF: predicated region fallthrough
CT: control target
= control target key end

     0   :  { %s1181_s0 = inlined_call_operand.hbm [shape: bf16[16,128], index: 0, kind: input, shape index: {}]   ;;  %s1182_s1 = inlined_call_operand.hbm [shape: bf16[2,128,128], index: 1, kind: input, shape index: {}]   ;;  %s1183_s2 = inlined_call_operand.hbm [shape: f32[2,1,128], index: 2, kind: input, shape index: {}]   ;;  %s1184_s3 = inlined_call_operand.hbm [shape: f32[16,128], index: 3, kind: output, shape index: {}]  }
   0x1   :  { %1195 = sst [smem:[#allocation22_spill]] %s1182_s1 }
   0x2   :  { %1196 = sst [smem:[#allocation23_spill]] %s1184_s3 }
   0x3   :  { %8 = vsyncpa [#allocation4], 0 }
   0x4   :  { %10 = vsyncpa [#allocation4 + $0x1], 0 }
   0x5   :  { %11 = vsyncpa [#allocation7], 0 }
   0x6   :  { %13 = vsyncpa [#allocation7 + $0x1], 0 }
   0x7   :  { %14 = vsyncpa [#allocation5], 0 }
   0x8   :  { %16 = vsyncpa [#allocation5 + $0x1], 0  ;;  %s926_s12 = smov 0   ;;  %s928_s13 = smov 0  }
   0x9   :  { %s930_s14 = smov 0   ;;  %s932_s15 = smov 0  }
   0xa   :  { %s934_s16 = smov 0   ;;  %s936_s17 = smov 0  }
   0xb   :  { %s938_s18 = smov 0   ;;  %s940_s19 = smov 0  }
   0xc   :  { %s942_s20 = smov 0   ;;  %s944_s21 = smov 0  }
   0xd   :  { %s946_s22 = smov 0  }
   0xe LB: > { %1197 = sst [smem:[#allocation13_spill]] %s882_s17  ;;  %s31_s23 = sadd.s32 1, %s894_s20  ;;  %s902_s22 = sphi %s946_s22, %s22_s22   ;;  %s898_s21 = sphi %s944_s21, %s1225_s21   ;;  %s894_s20 = sphi %s942_s20, %s1232_s20   ;;  %s890_s19 = sphi %s940_s19, %s1223_s19   ;;  %s886_s18 = sphi %s938_s18, %s1231_s18   ;;  %s882_s17 = sphi %s936_s17, %s1222_s17   ;;  %s878_s16 = sphi %s934_s16, %s1230_s16   ;;  %s874_s15 = sphi %s932_s15, %s1229_s15   ;;  %s870_s14 = sphi %s930_s14, %s1228_s14   ;;  %s866_s13 = sphi %s928_s13, %s1227_s13   ;;  %s862_s12 = sphi %s926_s12, %s1226_s12  }
   0xf   : > { %1198 = sst [smem:[#allocation14_spill]] %s890_s19  ;;  %p49_p0 = scmp.eq.s32.totalorder %s902_s22, 0 }
  0x10   : > { %1199 = sst [smem:[#allocation15_spill]] %s898_s21  ;;  %s67_s24 = sadd.s32 1, %s870_s14 }
  0x11   : > { %p74_p1 = scmp.ne.s32.totalorder %s870_s14, %s866_s13  ;;  %p80_p2 = scmp.ne.s32.totalorder %s866_s13, %s862_s12 }
  0x12   : > { %p1186_p4 = scmp.lt.s32.totalorder %s902_s22, 4  ;;  %s175_s25 = sand.u32 1, %s902_s22  }
  0x13   : > { %p76_p3 = por %p74_p1, %p49_p0  ;;  %s1185_s26 = sand.u32 1, %s870_s14  }
  0x14   : > { %s516_s27 = sshll.u32 %s1185_s26, 6  ;;  %s562_s28 = sshll.u32 %s894_s20, 6 }
  0x15   : > { %s1200_s1 = sld [smem:[#allocation22_spill]]  ;;  %s179_s5 = scalar_lea.vmem [#allocation6], %s516_s27 }
  0x16   : > { %s187_s6 = sshll.u32 %s179_s5, 4  ;;  %p1001_p5 = pnand %p1186_p4, %p76_p3  ;;  %s188_s6 = int_to_ptr.vmem [resolvable:$true] %s187_s6 }
  0x17   : > { %p519_p6 = scmp.ge.s32.totalorder %s902_s22, 1  ;;  %s1006_s9 = scalar_lea.sflag [#allocation7], %s175_s25 }
  0x18   : > { %s904_s10 = smov 64   ;;  %s905_s11 = smov 4  }
  0x19   : > { %p212_p7 = scmp.lt.s32.totalorder %s902_s22, 5  ;;  %s511_s29 = sadd.s32 4294967294, %s902_s22  }
  0x1a   : > { %p32_p9 = scmp.ge.s32.totalorder %s31_s23, 2  ;;  %s34_s25 = sadd.s32 1, %s898_s21 }
  0x1b   : > { %s184_s4 = scalar_lea.hbm %s1200_s1, %s562_s28  ;;  %p1012_p8 = pnand %p519_p6, %p212_p7 }
  0x1c   : > { %s185_s7 = sshll.u32 %s184_s4, 4  ;;  %s1017_s28 = sadd.s32 4294967295, %s902_s22   ;;  %s186_s7 = int_to_ptr.hbm [resolvable:$true] %s185_s7 }
  0x1d   : > { %585 = dma.hbm_to_vmem [thread:$0]  (!%p1001_p5), %s186_s7, 1024, %s188_s6, %s1006_s9, %s904_s10, %s904_s10, %s905_s11  }
  0x1e   : > { %s41_s30 = sadd.s32 1, %s882_s17  ;;  %p48_p10 = scmp.ne.s32.totalorder %s882_s17, %s878_s16 }
  0x1f   : > { %s1234_s23 = smov (%p32_p9, %s31_s23), 0  ;;  %s1236_s25 = smov (!%p32_p9, %s34_s25), %s898_s21 }
  0x20   : > { %1203 = sst [smem:[#allocation16_spill]] %s1234_s23  ;;  %p1036_p11 = por %p49_p0, %p48_p10 }
  0x21   : > { %p54_p12 = scmp.ne.s32.totalorder %s878_s16, %s874_s15  ;;  %p36_p13 = scmp.ge.s32.totalorder %s1236_s25, 2 }
  0x22   : > { %p55_p1 = scmp.eq.s32.totalorder %s1017_s28, 0  ;;  %s64_s5 = ssub.s32 %s894_s20, %s1234_s23 }
  0x23   : > { %p130_p3 = scmp.eq.s32.totalorder %s1017_s28, 3  ;;  %s1238_s25 = smov (%p36_p13, %s1236_s25), 0 }
  0x24   : > { %1205 = sst [smem:[#allocation17_spill]] %s1238_s25  ;;  %p1051_p6 = por %p55_p1, %p54_p12 }
  0x25   : > { %p65_p0 = scmp.eq.s32.totalorder %s64_s5, 0  ;;  %s38_s7 = ssub.s32 %s898_s21, %s1238_s25 }
  0x26   : > { %p1060_p7 = por %p80_p2, %p55_p1  ;;  %p39_p9 = scmp.eq.s32.totalorder %s38_s7, 0 }
  0x27   : > { %p1067_p13 = por %p130_p3, %p48_p10  ;;  %p136_p4 = scmp.eq.s32.totalorder %s511_s29, 3 }
  0x28   : > { %s1074_s26 = scalar_select %p65_p0, %s870_s14, %s67_s24  }
  0x29   : > { %s1208_s11 = scalar_select %p1067_p13, 1, 0 }
  0x2a   : > { %1210 = sst [smem:[#allocation19_spill]] %s1074_s26  ;;  %s156_s12 = sand.u32 1, %s882_s17  }
  0x2b   : > { %1209 = sst [smem:[#allocation18_spill]] %s1208_s11  ;;  %s514_s5 = sshll.u32 %s156_s12, 2 }
  0x2c   : > { %s1077_s1 = scalar_select %p39_p9, %s882_s17, %s41_s30  }
  0x2d   : > { %p1083_p2 = por %p136_p4, %p54_p12  ;;  %s515_s7 = sshll.u32 %s898_s21, 2 }
  0x2e   : > { %1211 = sst [smem:[#allocation20_spill]] %s1077_s1  ;;  %s160_s23 = scalar_lea.vmem [#allocation3], %s514_s5 }
  0x2f   : > { %s1212_s25 = scalar_select %p1083_p2, 1, 0 }
  0x30   : > { %s168_s3 = sshll.u32 %s160_s23, 4  ;;  %s164_s24 = scalar_lea.hbm %s1181_s0, %s515_s7  ;;  %s169_s3 = int_to_ptr.vmem [resolvable:$true] %s168_s3 }
  0x31   : > { %1213 = sst [smem:[#allocation21_spill]] %s1212_s25  ;;  %s166_s30 = sshll.u32 %s164_s24, 4  ;;  %s167_s30 = int_to_ptr.hbm [resolvable:$true] %s166_s30 }
  0x32   : > { %p1214_p10 = scmp.lt.s32.totalorder %s902_s22, 4  ;;  %s203_s17 = scalar_lea.hbm %s1183_s2, %s894_s20 }
  0x33   : > { %s157_s26 = scalar_lea.sflag [#allocation4], %s156_s12  ;;  %s205_s21 = sshll.u32 %s203_s17, 4  ;;  %s206_s21 = int_to_ptr.hbm [resolvable:$true] %s205_s21 }
  0x34   : > { %p580_p1 = pnand %p1214_p10, %p1036_p11  ;;  %s1215_s25 = sand.u32 1, %s870_s14  }
  0x35   : > { %s200_s5 = scalar_lea.vmem [#allocation8], %s1215_s25  ;;  %216 = sbr.rel (%p1012_p8) target bundleno = 272 (0x110), region = 32 }
  0x36   : > { %582 = dma.hbm_to_vmem [thread:$0]  (!%p580_p1), %s167_s30, 64, %s169_s3, %s157_s26  }
  0x37   : > { %s207_s23 = sshll.u32 %s200_s5, 4  ;;  %s1107_s19 = sand.u32 (!%p1012_p8), 1, %s878_s16   ;;  %s208_s23 = int_to_ptr.vmem [resolvable:$true] %s207_s23 }
  0x38   : > { %588 = dma.hbm_to_vmem [thread:$0]  (!%p1001_p5), %s206_s21, 16, %s208_s23, %s1006_s9  }
  0x39   : > { %s520_s1 = sshll.u32 (!%p1012_p8), %s1107_s19, 2  ;;  %s219_s4 = scalar_lea.sflag (!%p1012_p8), [#allocation4], %s1107_s19 }
  0x3a   : > { %s222_s3 = scalar_lea.vmem [#allocation3], %s520_s1 }
  0x3b   : > { %849 = dma.done.wait (%p1051_p6), %s219_s4, 64  }
  0x3c   : > { %851 = vsyncadd (%p1051_p6), %s219_s4, 4294967232  ;;  %s228_s17 = sand.u32 1, %s1017_s28   ;;  %s230_s21 = sand.u32 1, %s866_s13  }
  0x3d   : > { %s521_s26 = sshll.u32 %s230_s21, 6  ;;  %s229_s8 = scalar_lea.sflag [#allocation7], %s228_s17 }
  0x3e   : > { %s232_s9 = scalar_lea.vmem [#allocation6], %s521_s26 }
  0x3f   : > { %853 = dma.done.wait (%p1060_p7), %s229_s8, 1040  }
  0x40   : > { %855 = vsyncadd (%p1060_p7), %s229_s8, 4294966256  ;;  %s522_s27 = sshll.u32 %s1107_s19, 3  ;;  %s241_s25 = scalar_lea.vmem [#allocation8], %s230_s21 }
  0x41   : > { %s1122_s11 = scalar_lea.vmem [#allocation9], %s522_s27  ;;  %p523_p4 = scmp.ne.s32.totalorder %s886_s18, 0 }
  0x43   : > { %277 = sbr.rel (%p523_p4) target bundleno = 74 (0x4a), region = 48 }
  0x48   : > { %v278_v0 = vld [vmem:[%s222_s3] sm:$0xf] }
  0x49   : > { %279 = vst [vmem:[#allocation2] sm:$0xf] %v278_v0 }
  0x4a PF: > { %v570_v1 = vld [vmem:[%s232_s9 + $0x38] sm:$0xff]  ;;  %v569_v2 = vld [vmem:[%s232_s9 + $0x30] sm:$0xff]  ;;  %v568_v3 = vld [vmem:[%s232_s9 + $0x28] sm:$0xff]  ;;  %p556_p5 = scmp.ge.s32.totalorder %s886_s18, 1 }
  0x4b   : > { %349 = vmatpush.bf16.msra.mxu0 %v570_v1  ;;  %v567_v4 = vld [vmem:[%s232_s9 + $0x20] sm:$0xff]  ;;  %v566_v5 = vld [vmem:[%s232_s9 + $0x18] sm:$0xff]  ;;  %v565_v6 = vld [vmem:[%s232_s9 + $0x10] sm:$0xff] }
  0x4c   : > { %v564_v7 = vld [vmem:[%s232_s9 + $0x8] sm:$0xff]  ;;  %v563_v8 = vld [vmem:[%s232_s9] sm:$0xff]  ;;  %v685_v10 = vld [vmem:[%s241_s25] ss:$0 sm:$0xff] }
  0x4f   : > { %350 = vmatpush.bf16.msra.mxu0 %v569_v2 }
  0x50   : > { %v280_v9 = vld [vmem:[#allocation2] sm:$0xf] }
  0x53   : > { %351 = vmatpush.bf16.msra.mxu0 %v568_v3 }
  0x57   : > { %352 = vmatpush.bf16.msra.mxu0 %v567_v4 }
  0x5b   : > { %353 = vmatpush.bf16.msra.mxu0 %v566_v5 }
  0x5f   : > { %354 = vmatpush.bf16.msra.mxu0 %v565_v6 }
  0x63   : > { %355 = vmatpush.bf16.msra.mxu0 %v564_v7 }
  0x67   : > { %356 = vmatpush.bf16.msra.mxu0 %v563_v8 }
  0x6a   : > { %357 = vmatmul.bf16.vlgmr.msra.gmra.mxu0 %v280_v9 }
  0xe7   : > { %v358_v11 = vpop.f32.mrf.mxu0 }
  0xe8   : > { %v359_v12 = vadd.f32 %v685_v10, %v358_v11 }
  0xea   : > { %v362_v13 = vmax.f32 %v359_v12, 0.0 }
  0xeb   : > { %366 = sbr.rel (%p556_p5) target bundleno = 243 (0xf3), region = 52 }
  0xef   : > { %v360_v14 = vpop.f32.mrf.mxu0 }
  0xf0   : > { %v367_v15 = vpack.c.bf16 %v362_v13, %v362_v13 }
  0xf2   : > { %368 = vst [vmem:[#allocation2] sm:$0xf] %v367_v15 }
  0xf3 PF: > { %p557_p8 = scmp.ne.s32.totalorder %s886_s18, 1 }
  0xf5   : > { %372 = sbr.rel (%p557_p8) target bundleno = 251 (0xfb), region = 56 }
  0xfa   : > { %373 = vst [vmem:[%s1122_s11] sm:$0xff] %v362_v13 }
  0xfb PF: > { %s1216_s28 = sld [smem:[#allocation14_spill]]  ;;  %s387_s29 = sshll.u32 %s1122_s11, 4  ;;  %s388_s29 = int_to_ptr.vmem [resolvable:$true] %s387_s29 }
  0xfc   : > { %s1218_s24 = sld [smem:[#allocation23_spill]]  ;;  %s375_s23 = scalar_lea.sflag [#allocation5], %s1107_s19 }
 0x101   : > { %s559_s10 = sshll.u32 %s1216_s28, 3 }
 0x102   : > { %s385_s30 = scalar_lea.hbm %s1218_s24, %s559_s10  ;;  %s796_s17 = scalar_lea.hbm %s1218_s24, 16 }
 0x103   : > { %s389_s5 = sshll.u32 %s385_s30, 4  ;;  %s390_s5 = int_to_ptr.hbm [resolvable:$true] %s389_s5 }
 0x104   : > { %s790_s1 = sshra.s32 %s390_s5, 4  ;;  %s791_s1 = int_to_ptr.hbm [resolvable:$true] %s790_s1 }
 0x105   : > { %s792_s18 = scalar_lea.hbm %s791_s1, 8  ;;  %p797_p6 = scmp.lt.s32.totalorder %s791_s1, %s1218_s24 }
 0x106   : > { %p793_p11 = scmp.ne.s32.totalorder %s791_s1, %s792_s18  ;;  %p798_p0 = scmp.lt.s32.totalorder %s796_s17, %s792_s18 }
 0x108   : > { %p794_p12 = pnand %p793_p11, %p1067_p13  ;;  %p799_p7 = por %p798_p0, %p797_p6 }
 0x10a   : > { %p795_p3 = pneg %p794_p12 }
 0x10c   : > { %p800_p9 = pnand %p799_p7, %p795_p3 }
 0x10e   : > { %803 = shalt.err (!%p800_p9)
}
 0x10f   : > { %577 = dma.vmem_to_hbm [thread:$0]  (%p1067_p13), %s388_s29, 128, %s390_s5, %s375_s23  }
 0x110 PF: > { %p594_p10 = scmp.ge.s32.totalorder %s902_s22, 2  ;;  %s401_s8 = sand.u32 1, %s874_s15  }
 0x111   : > { %s402_s9 = scalar_lea.sflag [#allocation5], %s401_s8 }
 0x112   : > { %p590_p1 = pnand %p594_p10, %p1083_p2 }
 0x114   : > { %p591_p4 = pneg %p590_p1 }
 0x116   : > { %857 = dma.done.wait (%p591_p4), %s402_s9, 128  }
 0x117   : > { %859 = vsyncadd (%p591_p4), %s402_s9, 4294967168  ;;  %s22_s22 = sadd.s32 1, %s902_s22   ;;  %s1220_s27 = sld [smem:[#allocation19_spill]] }
 0x118   : > { %p19_p5 = scmp.ge.s32.totalorder %s22_s22, 6   ;;  %s1221_s25 = sld [smem:[#allocation13_spill]] }
 0x119   : > { %s1222_s17 = sld [smem:[#allocation20_spill]]  ;;  %s1226_s12 = smov %s866_s13 }
 0x11a   : > { %s1223_s19 = sld [smem:[#allocation15_spill]]  ;;  %s1227_s13 = smov %s870_s14 }
 0x11b   : > { %s1224_s11 = sld [smem:[#allocation16_spill]]  ;;  %s1229_s15 = smov %s878_s16 }
 0x11c   : > { %s1225_s21 = sld [smem:[#allocation17_spill]]  ;;  %s1231_s18 = smov %s894_s20 }
 0x11d   : > { %s1228_s14 = smov %s1220_s27  ;;  %21 = sbr.rel (!%p19_p5) target bundleno = 14 (0xe), region = 113 }
 0x11e   : > { %s1230_s16 = smov %s1221_s25 }
 0x121   : > { %s1232_s20 = smov %s1224_s11 }
 0x122   :  { %408 = vsyncpa [#allocation4], 1 }
 0x123   :  { %410 = vsyncpa [#allocation4 + $0x1], 1 }
 0x124   :  { %411 = vsyncpa [#allocation7], 1 }
 0x125   :  { %413 = vsyncpa [#allocation7 + $0x1], 1 }
 0x126   :  { %414 = vsyncpa [#allocation5], 1 }
 0x127   :  { %416 = vsyncpa [#allocation5 + $0x1], 1 }

</bundles_post_ra>
